<compile_context>
chip_gen: v7x
topology: tpu7x:2x2x1
jax: 0.10.0
libtpu: 0.0.40
codegen_flags: <defaults>
</compile_context>

<pallas_src>
import jax
import jax.numpy as jnp
import numpy as np
from jax import lax
from jax.experimental import pallas as pl
from jax.experimental.pallas import tpu as pltpu

LRELU_SLOPE = 0.1
BN_EPS = 1e-5
VMEM_LIMIT = 32 * 1024 * 1024   # explicit scoped-VMEM budget, safe on v5e/v6e/v7x
MAX_ROW_TILE = 512              # rows per grid step for the conv matmuls
MAX_K_TILE = 512                # feature columns per grid step for the heads


def _round_up(x, m):
    return (x + m - 1) // m * m


def _pad2(a, rows, cols):
    r, c = a.shape
    if r == rows and c == cols:
        return a
    return jnp.pad(a, ((0, rows - r), (0, cols - c)))


# ----------------------------- Pallas kernels ------------------------------

def _matmul_lrelu_kernel(x_ref, w_ref, o_ref):
    # conv1 as matmul over im2col patches, fused LeakyReLU(0.1)
    y = jnp.dot(x_ref[...], w_ref[...], preferred_element_type=jnp.float32)
    o_ref[...] = jnp.maximum(y, LRELU_SLOPE * y)


def conv_lrelu(patches, w, *, use_bf16=False):
    M, K = patches.shape
    _, cout = w.shape
    cout_p = _round_up(cout, 128)
    tm = min(MAX_ROW_TILE, _round_up(M, 8))
    Mp = _round_up(M, tm)
    dt = jnp.bfloat16 if use_bf16 else jnp.float32
    xp = _pad2(patches, Mp, K).astype(dt)
    wp = _pad2(w, K, cout_p).astype(dt)
    bpe = 2 if use_bf16 else 4
    out = pl.pallas_call(
        _matmul_lrelu_kernel,
        out_shape=jax.ShapeDtypeStruct((Mp, cout_p), jnp.float32),
        grid=(Mp // tm,),
        in_specs=[pl.BlockSpec((tm, K), lambda i: (i, 0)),
                  pl.BlockSpec((K, cout_p), lambda i: (0, 0))],
        out_specs=pl.BlockSpec((tm, cout_p), lambda i: (i, 0)),
        compiler_params=pltpu.CompilerParams(
            dimension_semantics=("parallel",),
            vmem_limit_bytes=VMEM_LIMIT),
        cost_estimate=pl.CostEstimate(
            flops=2 * Mp * K * cout_p, transcendentals=0,
            bytes_accessed=(Mp * K + K * cout_p) * bpe + Mp * cout_p * 4),
    )(xp, wp)
    return out[:M, :cout]


def _matmul_stats_kernel(x_ref, w_ref, z_ref, s_ref, ss_ref):
    # conv2 matmul (pass A of BatchNorm): write z tile, accumulate global sum/sumsq
    @pl.when(pl.program_id(0) == 0)
    def _():
        s_ref[...] = jnp.zeros_like(s_ref)
        ss_ref[...] = jnp.zeros_like(ss_ref)

    z = jnp.dot(x_ref[...], w_ref[...], preferred_element_type=jnp.float32)
    z_ref[...] = z
    s_ref[...] += jnp.sum(z, axis=0, keepdims=True)
    ss_ref[...] += jnp.sum(z * z, axis=0, keepdims=True)


def conv_matmul_stats(patches, w, *, use_bf16=False):
    M, K = patches.shape
    _, cout = w.shape
    cout_p = _round_up(cout, 128)
    tm = min(MAX_ROW_TILE, _round_up(M, 8))
    Mp = _round_up(M, tm)
    dt = jnp.bfloat16 if use_bf16 else jnp.float32
    xp = _pad2(patches, Mp, K).astype(dt)    # zero rows contribute 0 to sum/sumsq
    wp = _pad2(w, K, cout_p).astype(dt)
    bpe = 2 if use_bf16 else 4
    z, s, ss = pl.pallas_call(
        _matmul_stats_kernel,
        out_shape=(jax.ShapeDtypeStruct((Mp, cout_p), jnp.float32),
                   jax.ShapeDtypeStruct((1, cout_p), jnp.float32),
                   jax.ShapeDtypeStruct((1, cout_p), jnp.float32)),
        grid=(Mp // tm,),
        in_specs=[pl.BlockSpec((tm, K), lambda i: (i, 0)),
                  pl.BlockSpec((K, cout_p), lambda i: (0, 0))],
        out_specs=(pl.BlockSpec((tm, cout_p), lambda i: (i, 0)),
                   pl.BlockSpec((1, cout_p), lambda i: (0, 0)),
                   pl.BlockSpec((1, cout_p), lambda i: (0, 0))),
        compiler_params=pltpu.CompilerParams(
            dimension_semantics=("arbitrary",),   # stats output is revisited
            vmem_limit_bytes=VMEM_LIMIT),
        cost_estimate=pl.CostEstimate(
            flops=2 * Mp * K * cout_p, transcendentals=0,
            bytes_accessed=(Mp * K + K * cout_p) * bpe + Mp * cout_p * 4),
    )(xp, wp)
    return z, s, ss


def _bn_lrelu_kernel(z_ref, sc_ref, sh_ref, o_ref):
    # pass B of BatchNorm: y = z*scale + shift, fused LeakyReLU
    y = z_ref[...] * sc_ref[...] + sh_ref[...]
    o_ref[...] = jnp.maximum(y, LRELU_SLOPE * y)


def bn_lrelu(z, scale_p, shift_p):
    Mp, cp = z.shape
    tm = min(MAX_ROW_TILE, Mp)
    return pl.pallas_call(
        _bn_lrelu_kernel,
        out_shape=jax.ShapeDtypeStruct((Mp, cp), jnp.float32),
        grid=(Mp // tm,),
        in_specs=[pl.BlockSpec((tm, cp), lambda i: (i, 0)),
                  pl.BlockSpec((1, cp), lambda i: (0, 0)),
                  pl.BlockSpec((1, cp), lambda i: (0, 0))],
        out_specs=pl.BlockSpec((tm, cp), lambda i: (i, 0)),
        compiler_params=pltpu.CompilerParams(
            dimension_semantics=("parallel",),
            vmem_limit_bytes=VMEM_LIMIT),
    )(z, scale_p, shift_p)


def _heads_kernel(x_ref, w_ref, b_ref, o_ref):
    # both Linear heads as one K-tiled matmul; output (lane-padded to 128) is the accumulator
    @pl.when(pl.program_id(0) == 0)
    def _():
        o_ref[...] = jnp.broadcast_to(b_ref[...], o_ref.shape)
    o_ref[...] += jnp.dot(x_ref[...], w_ref[...], preferred_element_type=jnp.float32)


def heads(x, w, b, *, use_bf16=False):
    N, F = x.shape
    _, H = w.shape
    Hp = _round_up(H, 128)
    tk = min(MAX_K_TILE, _round_up(F, 128))
    Fp = _round_up(F, tk)
    dt = jnp.bfloat16 if use_bf16 else jnp.float32
    xp = _pad2(x, N, Fp).astype(dt)
    wp = _pad2(w, Fp, Hp).astype(dt)
    bp = _pad2(b, 1, Hp)                      # bias stays f32 (added to f32 accumulator)
    bpe = 2 if use_bf16 else 4
    out = pl.pallas_call(
        _heads_kernel,
        out_shape=jax.ShapeDtypeStruct((N, Hp), jnp.float32),
        grid=(Fp // tk,),
        in_specs=[pl.BlockSpec((N, tk), lambda k: (0, k)),
                  pl.BlockSpec((tk, Hp), lambda k: (k, 0)),
                  pl.BlockSpec((1, Hp), lambda k: (0, 0))],
        out_specs=pl.BlockSpec((N, Hp), lambda k: (0, 0)),
        compiler_params=pltpu.CompilerParams(
            dimension_semantics=("arbitrary",),
            vmem_limit_bytes=VMEM_LIMIT),
        cost_estimate=pl.CostEstimate(
            flops=2 * N * Fp * Hp, transcendentals=0,
            bytes_accessed=(N * Fp + Fp * Hp) * bpe + N * Hp * 4),
    )(xp, wp, bp)
    return out[:, :H]


# ------------------------------- JAX glue -----------------------------------

def im2col_nhwc(x, k=4, s=2, p=1):
    """x: (N, H, W, C) -> (N*Ho*Wo, k*k*C), patch column order (kh, kw, c)."""
    N, H, W, C = x.shape
    xp = jnp.pad(x, ((0, 0), (p, p), (p, p), (0, 0)))
    Ho = (H + 2 * p - k) // s + 1
    Wo = (W + 2 * p - k) // s + 1
    cols = []
    for kh in range(k):
        for kw in range(k):
            cols.append(xp[:, kh:kh + s * Ho:s, kw:kw + s * Wo:s, :])  # (N,Ho,Wo,C)
    pt = jnp.concatenate(cols, axis=-1)                 # (N, Ho, Wo, k*k*C)
    return pt.reshape(N * Ho * Wo, k * k * C), (Ho, Wo)


def _conv_weight_matrix(w):
    """PyTorch (O, I, kh, kw) -> ((kh,kw,I), O) matching im2col_nhwc column order."""
    O, I, kh, kw = w.shape
    return w.transpose(2, 3, 1, 0).reshape(kh * kw * I, O)


def _permute_head_weight(w_flat, C, H, W):
    """Fold the PyTorch NCHW flatten into the head weight: (1, C*H*W) NCHW -> (H*W*C,) NHWC."""
    return w_flat.reshape(C, H, W).transpose(1, 2, 0).reshape(-1)


def discriminator_forward(x, params, *, use_bf16=False):
    N, Cin, H, W = x.shape
    D = params["w1"].shape[0]
    C2 = 2 * D

    x_nhwc = jnp.transpose(x, (0, 2, 3, 1))             # (N, H, W, 1)

    # conv1 (1 -> D, k4 s2 p1, no bias) + LeakyReLU, NHWC output
    p1, (H1, W1) = im2col_nhwc(x_nhwc)                  # (N*H1*W1, 16*Cin)
    y1 = conv_lrelu(p1, _conv_weight_matrix(params["w1"]), use_bf16=use_bf16)
    y1_nhwc = y1.reshape(N, H1, W1, D)

    # conv2 (D -> 2D) + BatchNorm2d (training stats, two-pass) + LeakyReLU
    p2, (H2, W2) = im2col_nhwc(y1_nhwc)                 # (N*H2*W2, 16*D)
    M2 = N * H2 * W2
    z, s, ss = conv_matmul_stats(p2, _conv_weight_matrix(params["w2"]),
                                 use_bf16=use_bf16)
    mean = s[0, :C2] / M2                                # biased stats over N*H2*W2
    var = jnp.maximum(ss[0, :C2] / M2 - mean * mean, 0.0)
    scale = params["gamma"] * lax.rsqrt(var + BN_EPS)
    shift = params["beta"] - mean * scale
    scale_p = _pad2(scale[None, :], 1, z.shape[1])
    shift_p = _pad2(shift[None, :], 1, z.shape[1])
    y2 = bn_lrelu(z, scale_p, shift_p)[:M2, :C2]         # (M2, C2) in NHWC row order

    flat = y2.reshape(N, H2 * W2 * C2)                   # NHWC flatten

    # heads: permute PyTorch NCHW-flatten weights to NHWC order once, fuse both heads
    w_rf = _permute_head_weight(params["w_rf"], C2, H2, W2)
    w_dom = _permute_head_weight(params["w_dom"], C2, H2, W2)
    wcat = jnp.stack([w_rf, w_dom], axis=1)              # (F, 2)
    bcat = jnp.concatenate([params["b_rf"], params["b_dom"]])[None, :]  # (1, 2)
    out = heads(flat, wcat, bcat, use_bf16=use_bf16)     # (N, 2)
    return out[:, 0:1], out[:, 1:2]


# ---------------------------- pure-JAX reference ----------------------------

def reference_forward(x, params):
    def conv(x, w):
        dn = lax.conv_dimension_numbers(x.shape, w.shape, ("NCHW", "OIHW", "NCHW"))
        return lax.conv_general_dilated(x, w, (2, 2), ((1, 1), (1, 1)),
                                        dimension_numbers=dn,
                                        precision=lax.Precision.HIGHEST)

    y1 = conv(x, params["w1"])
    y1 = jnp.where(y1 >= 0, y1, LRELU_SLOPE * y1)
    y2 = conv(y1, params["w2"])
    mean = y2.mean(axis=(0, 2, 3), keepdims=True)
    var = ((y2 - mean) ** 2).mean(axis=(0, 2, 3), keepdims=True)
    y2 = (y2 - mean) * lax.rsqrt(var + BN_EPS)
    y2 = y2 * params["gamma"][None, :, None, None] + params["beta"][None, :, None, None]
    y2 = jnp.where(y2 >= 0, y2, LRELU_SLOPE * y2)
    flat = y2.reshape(y2.shape[0], -1)
    rf = jnp.dot(flat, params["w_rf"].T, precision=lax.Precision.HIGHEST) + params["b_rf"]
    dom = jnp.dot(flat, params["w_dom"].T, precision=lax.Precision.HIGHEST) + params["b_dom"]
    return rf, dom


# --------------------------------- main --------------------------------------

if __name__ == "__main__":
    # small shapes: input_dim D=8, input spectrogram (N=2, 1, 16, 16)
    # (original module hardcodes a 128x862 input; flattened_dim scales accordingly)
    N, D, H, W = 2, 8, 16, 16
    F = (2 * D) * (H // 4) * (W // 4)

    key = jax.random.PRNGKey(0)
    kx, k1, k2, k3, k4, k5, k6 = jax.random.split(key, 7)

    x = jax.random.normal(kx, (N, 1, H, W), dtype=jnp.float32)
    params = {
        "w1": 0.1 * jax.random.normal(k1, (D, 1, 4, 4), dtype=jnp.float32),
        "w2": 0.05 * jax.random.normal(k2, (2 * D, D, 4, 4), dtype=jnp.float32),
        "gamma": jnp.ones((2 * D,), dtype=jnp.float32),   # BatchNorm2d default init
        "beta": jnp.zeros((2 * D,), dtype=jnp.float32),
        "w_rf": 0.02 * jax.random.normal(k3, (1, F), dtype=jnp.float32),
        "b_rf": 0.02 * jax.random.normal(k4, (1,), dtype=jnp.float32),
        "w_dom": 0.02 * jax.random.normal(k5, (1, F), dtype=jnp.float32),
        "b_dom": 0.02 * jax.random.normal(k6, (1,), dtype=jnp.float32),
    }

    rf_ref, dom_ref = reference_forward(x, params)

    # f32 path: tight check
    rf, dom = discriminator_forward(x, params, use_bf16=False)
    rf, dom = jax.block_until_ready((rf, dom))
    assert rf.shape == (N, 1) and dom.shape == (N, 1)
    np.testing.assert_allclose(np.asarray(rf), np.asarray(rf_ref), rtol=2e-3, atol=2e-3)
    np.testing.assert_allclose(np.asarray(dom), np.asarray(dom_ref), rtol=2e-3, atol=2e-3)

    # bf16 matmul-input fast path: loose check
    rf16, dom16 = discriminator_forward(x, params, use_bf16=True)
    rf16, dom16 = jax.block_until_ready((rf16, dom16))
    np.testing.assert_allclose(np.asarray(rf16), np.asarray(rf_ref), rtol=5e-2, atol=5e-2)
    np.testing.assert_allclose(np.asarray(dom16), np.asarray(dom_ref), rtol=5e-2, atol=5e-2)

    print("KERNEL_OK")
</pallas_src>

<mosaic_0001>
module attributes {stable_mosaic.version = 11 : i64} {
  func.func @_matmul_lrelu_kernel(%arg0: i32, %arg1: memref<128x16xf32, #tpu.memory_space<vmem>>, %arg2: memref<16x128xf32, #tpu.memory_space<vmem>>, %arg3: memref<128x128xf32, #tpu.memory_space<vmem>>) attributes {dimension_semantics = [#tpu.dimension_semantics<parallel>], iteration_bounds = array<i64: 1>, scalar_prefetch = 0 : i64, scratch_operands = 0 : i64, tpu.core_type = #tpu.core_type<tc>, window_params = [{transform_indices = @transform_0, window_bounds = array<i64: 128, 16>}, {pipeline_mode = #tpu.pipeline_mode<synchronous>, transform_indices = @transform_1, window_bounds = array<i64: 16, 128>}, {transform_indices = @transform_2, window_bounds = array<i64: 128, 128>}]} {
    %c0 = arith.constant 0 : index
    %c0_0 = arith.constant 0 : index
    %0 = vector.load %arg1[%c0, %c0_0] : memref<128x16xf32, #tpu.memory_space<vmem>>, vector<128x16xf32>
    %c0_1 = arith.constant 0 : index
    %c0_2 = arith.constant 0 : index
    %1 = vector.load %arg2[%c0_1, %c0_2] : memref<16x128xf32, #tpu.memory_space<vmem>>, vector<16x128xf32>
    %cst = arith.constant dense<0.000000e+00> : vector<128x128xf32>
    %2 = tpu.matmul %0, %1, %cst {dimension_numbers = #tpu.dot_dimension_numbers<[1], [0], [0], [1], [0, 0, 1, 1], [], []>} : vector<128x16xf32>, vector<16x128xf32>, vector<128x128xf32> -> vector<128x128xf32>
    %cst_3 = arith.constant 1.000000e-01 : f32
    %3 = vector.broadcast %cst_3 : f32 to vector<128x128xf32>
    %4 = arith.mulf %3, %2 : vector<128x128xf32>
    %5 = arith.maximumf %2, %4 : vector<128x128xf32>
    %c0_4 = arith.constant 0 : index
    %c0_5 = arith.constant 0 : index
    %6 = vector.load %arg3[%c0_4, %c0_5] : memref<128x128xf32, #tpu.memory_space<vmem>>, vector<128x128xf32>
    tpu.vector_store %arg3[%c0_4, %c0_5], %5 {strides = array<i32>} : memref<128x128xf32, #tpu.memory_space<vmem>>, vector<128x128xf32>,
    return
  }
  func.func @transform_0(%arg0: i32) -> (i32, i32) {
    %c0_i32 = arith.constant 0 : i32
    %c0_i32_0 = arith.constant 0 : i32
    return %arg0, %c0_i32 : i32, i32
  }
  func.func @transform_1(%arg0: i32) -> (i32, i32) {
    %c0_i32 = arith.constant 0 : i32
    %c0_i32_0 = arith.constant 0 : i32
    %c0_i32_1 = arith.constant 0 : i32
    return %c0_i32, %c0_i32_0 : i32, i32
  }
  func.func @transform_2(%arg0: i32) -> (i32, i32) {
    %c0_i32 = arith.constant 0 : i32
    %c0_i32_0 = arith.constant 0 : i32
    return %arg0, %c0_i32 : i32, i32
  }
}

</mosaic_0001>

<bundles_post_ra>
// kernel: tpu_custom_call.1
= control target key start
LH: loop header
LB: loop body
LE: loop exit
PB: predicated region body
PF: predicated region fallthrough
CT: control target
= control target key end

     0   :  { %vm30_vm0 = vcmask 130048   ;;  %s483_s0 = inlined_call_operand.vmem [shape: f32[128,16], index: 0, kind: input, shape index: {}]   ;;  %s484_s1 = inlined_call_operand.vmem [shape: f32[16,128], index: 1, kind: input, shape index: {}]   ;;  %s485_s2 = inlined_call_operand.hbm [shape: f32[128,128], index: 2, kind: output, shape index: {}]  }
   0x1   :  { %v28_v0 = vld [vmem:[%s484_s1] sm:$0xff]  ;;  %v29_v1 = vld [vmem:[%s484_s1 + $0x8] sm:$0xff]  ;;  %v14_v7 = vld [vmem:[%s483_s0 + $0x10] sm:$0xff] }
   0x2   :  { %v12_v2 = vld [vmem:[%s483_s0] sm:$0xff]  ;;  %v350_v3 = vpack.c.bf16 %v29_v1, %v28_v0  ;;  %v13_v5 = vld [vmem:[%s483_s0 + $0x8] sm:$0xff]  ;;  %v22_v8 = vld [vmem:[%s483_s0 + $0x50] sm:$0xff] }
   0x3   :  { %326 = vmatprep.mubr.msk.f32.mxu0 %vm30_vm0, %v12_v2  ;;  %v20_v4 = vld [vmem:[%s483_s0 + $0x40] sm:$0xff]  ;;  %v21_v6 = vld [vmem:[%s483_s0 + $0x48] sm:$0xff] }
   0x4   :  { %338 = vmatprep.mubr.msk.f32.mxu1 %vm30_vm0, %v20_v4  ;;  %351 = vmatprep.subr.bf16.mxu0 %v350_v3 }
   0x5   :  { %354 = vmatprep.subr.bf16.mxu1 %v350_v3  ;;  %353 = vmatpush3.bf16.msra.mxu0 %v350_v3 }
   0x6   :  { %355 = vmatpush3.bf16.msra.mxu1 %v350_v3 }
   0x7   :  { %7 = vsyncpa [#allocation3], 0  ;;  %v15_v9 = vld [vmem:[%s483_s0 + $0x18] sm:$0xff]  ;;  %v16_v11 = vld [vmem:[%s483_s0 + $0x20] sm:$0xff] }
   0x8   :  { %327 = vmatmul.mubr.msk.f32.vlgmr.msra.gmra.mrb[0].mxu0 %vm30_vm0, %v13_v5  ;;  %v23_v10 = vld [vmem:[%s483_s0 + $0x58] sm:$0xff]  ;;  %v24_v12 = vld [vmem:[%s483_s0 + $0x60] sm:$0xff]  ;;  %v17_v13 = vld [vmem:[%s483_s0 + $0x28] sm:$0xff] }
   0x9   :  { %339 = vmatmul.mubr.msk.f32.vlgmr.msra.gmra.mrb[0].mxu1 %vm30_vm0, %v21_v6  ;;  %329 = vmatprep.mubr.msk.f32.mxu0 %vm30_vm0, %v14_v7  ;;  %v25_v14 = vld [vmem:[%s483_s0 + $0x68] sm:$0xff]  ;;  %v18_v15 = vld [vmem:[%s483_s0 + $0x30] sm:$0xff]  ;;  %v19_v17 = vld [vmem:[%s483_s0 + $0x38] sm:$0xff] }
   0xa   :  { %341 = vmatprep.mubr.msk.f32.mxu1 %vm30_vm0, %v22_v8  ;;  %v26_v16 = vld [vmem:[%s483_s0 + $0x70] sm:$0xff]  ;;  %v27_v18 = vld [vmem:[%s483_s0 + $0x78] sm:$0xff]  ;;  %s383_s0 = smov [#allocation2]  }
   0xb   :  { %s277_s16 = sshll.u32 %s383_s0, 4  ;;  %s278_s16 = int_to_ptr.vmem [resolvable:$true] %s277_s16 }
   0xc   :  { %330 = vmatmul.mubr.msk.f32.gmra.mrb[2].mxu0 %vm30_vm0, %v15_v9  ;;  %s359_s17 = scalar_lea.vmem %s278_s16, 2048  ;;  %p364_p1 = scmp.lt.s32.totalorder %s278_s16, %s278_s16 }
   0xd   :  { %342 = vmatmul.mubr.msk.f32.gmra.mrb[2].mxu1 %vm30_vm0, %v23_v10  ;;  %332 = vmatprep.mubr.msk.f32.mxu0 %vm30_vm0, %v16_v11  ;;  %p360_p0 = scmp.ne.s32.totalorder %s278_s16, %s359_s17  ;;  %p365_p2 = scmp.lt.s32.totalorder %s359_s17, %s359_s17 }
   0xe   :  { %344 = vmatprep.mubr.msk.f32.mxu1 %vm30_vm0, %v24_v12 }
   0xf   :  { %p366_p3 = por %p365_p2, %p364_p1 }
  0x10   :  { %333 = vmatmul.mubr.msk.f32.gmra.mrb[4].mxu0 %vm30_vm0, %v17_v13 }
  0x11   :  { %345 = vmatmul.mubr.msk.f32.gmra.mrb[4].mxu1 %vm30_vm0, %v25_v14  ;;  %335 = vmatprep.mubr.msk.f32.mxu0 %vm30_vm0, %v18_v15  ;;  %p367_p4 = pnand %p366_p3, %p360_p0 }
  0x12   :  { %347 = vmatprep.mubr.msk.f32.mxu1 %vm30_vm0, %v26_v16 }
  0x14   :  { %336 = vmatmul.mubr.msk.f32.gmra.mrb[6].mxu0 %vm30_vm0, %v19_v17 }
  0x15   :  { %348 = vmatmul.mubr.msk.f32.gmra.mrb[6].mxu1 %vm30_vm0, %v27_v18 }
  0xdb   :  { %v328_v19 = vpop.f32.mrb[0].mxu0 }
  0xdc   :  { %v340_v20 = vpop.f32.mrb[0].mxu1  ;;  %v225_v21 = vmul.f32 0.1, %v328_v19  ;;  %v145_v23 = vpop.f32.mrb[1].mxu0 }
  0xdd   :  { %v233_v22 = vmul.f32 0.1, %v340_v20  ;;  %v185_v24 = vpop.f32.mrb[1].mxu1  ;;  %v224_v25 = vmul.f32 0.1, %v145_v23 }
  0xde   :  { %v232_v26 = vmul.f32 0.1, %v185_v24  ;;  %v241_v27 = vmax.f32 %v328_v19, %v225_v21 }
  0xdf   :  { %v249_v28 = vmax.f32 %v340_v20, %v233_v22  ;;  %v240_v29 = vmax.f32 %v145_v23, %v224_v25  ;;  %v331_v31 = vpop.f32.mrb[2].mxu0 }
  0xe0   :  { %v248_v30 = vmax.f32 %v185_v24, %v232_v26  ;;  %v343_v32 = vpop.f32.mrb[2].mxu1  ;;  %257 = vst [vmem:[#allocation2 + $0x8] sm:$0xff] %v241_v27  ;;  %v227_v33 = vmul.f32 0.1, %v331_v31  ;;  %v155_v35 = vpop.f32.mrb[3].mxu0 }
  0xe1   :  { %265 = vst [vmem:[#allocation2 + $0x48] sm:$0xff] %v249_v28  ;;  %v235_v34 = vmul.f32 0.1, %v343_v32  ;;  %v195_v36 = vpop.f32.mrb[3].mxu1  ;;  %256 = vst [vmem:[#allocation2] sm:$0xff] %v240_v29 }
  0xe2   :  { %264 = vst [vmem:[#allocation2 + $0x40] sm:$0xff] %v248_v30  ;;  %v226_v37 = vmul.f32 0.1, %v155_v35  ;;  %v234_v38 = vmul.f32 0.1, %v195_v36  ;;  %v243_v39 = vmax.f32 %v331_v31, %v227_v33 }
  0xe3   :  { %v251_v40 = vmax.f32 %v343_v32, %v235_v34  ;;  %v334_v43 = vpop.f32.mrb[4].mxu0 }
  0xe4   :  { %v242_v41 = vmax.f32 %v155_v35, %v226_v37  ;;  %v250_v42 = vmax.f32 %v195_v36, %v234_v38  ;;  %v346_v44 = vpop.f32.mrb[4].mxu1  ;;  %259 = vst [vmem:[#allocation2 + $0x18] sm:$0xff] %v243_v39  ;;  %v229_v45 = vmul.f32 0.1, %v334_v43  ;;  %v165_v47 = vpop.f32.mrb[5].mxu0 }
  0xe5   :  { %267 = vst [vmem:[#allocation2 + $0x58] sm:$0xff] %v251_v40  ;;  %v237_v46 = vmul.f32 0.1, %v346_v44  ;;  %v205_v48 = vpop.f32.mrb[5].mxu1  ;;  %v228_v49 = vmul.f32 0.1, %v165_v47 }
  0xe6   :  { %258 = vst [vmem:[#allocation2 + $0x10] sm:$0xff] %v242_v41  ;;  %266 = vst [vmem:[#allocation2 + $0x50] sm:$0xff] %v250_v42  ;;  %v236_v50 = vmul.f32 0.1, %v205_v48  ;;  %v245_v51 = vmax.f32 %v334_v43, %v229_v45 }
  0xe7   :  { %v253_v52 = vmax.f32 %v346_v44, %v237_v46  ;;  %v244_v53 = vmax.f32 %v165_v47, %v228_v49  ;;  %v337_v55 = vpop.f32.mrb[6].mxu0 }
  0xe8   :  { %v252_v54 = vmax.f32 %v205_v48, %v236_v50  ;;  %v349_v56 = vpop.f32.mrb[6].mxu1  ;;  %261 = vst [vmem:[#allocation2 + $0x28] sm:$0xff] %v245_v51  ;;  %v231_v57 = vmul.f32 0.1, %v337_v55  ;;  %v175_v59 = vpop.f32.mrb[7].mxu0 }
  0xe9   :  { %269 = vst [vmem:[#allocation2 + $0x68] sm:$0xff] %v253_v52  ;;  %v239_v58 = vmul.f32 0.1, %v349_v56  ;;  %v215_v60 = vpop.f32.mrb[7].mxu1  ;;  %260 = vst [vmem:[#allocation2 + $0x20] sm:$0xff] %v244_v53 }
  0xea   :  { %268 = vst [vmem:[#allocation2 + $0x60] sm:$0xff] %v252_v54  ;;  %v230_v61 = vmul.f32 0.1, %v175_v59  ;;  %v238_v62 = vmul.f32 0.1, %v215_v60  ;;  %v247_v63 = vmax.f32 %v337_v55, %v231_v57 }
  0xeb   :  { %v255_v0 = vmax.f32 %v349_v56, %v239_v58 }
  0xec   :  { %v246_v1 = vmax.f32 %v175_v59, %v230_v61  ;;  %v254_v2 = vmax.f32 %v215_v60, %v238_v62  ;;  %263 = vst [vmem:[#allocation2 + $0x38] sm:$0xff] %v247_v63 }
  0xed   :  { %271 = vst [vmem:[#allocation2 + $0x78] sm:$0xff] %v255_v0 }
  0xee   :  { %262 = vst [vmem:[#allocation2 + $0x30] sm:$0xff] %v246_v1  ;;  %270 = vst [vmem:[#allocation2 + $0x70] sm:$0xff] %v254_v2 }
  0xef   :  { %370 = shalt.err (!%p367_p4)
}
  0xf0   :  { %s371_s19 = scalar_lea.hbm %s485_s2, 2048 }
  0xf1   :  { %p372_p5 = scmp.ne.s32.totalorder %s485_s2, %s371_s19  ;;  %p375_p6 = scmp.lt.u32.totalorder %s371_s19, %s485_s2 }
  0xf3   :  { %p377_p7 = pnand %p375_p6, %p372_p5 }
  0xf5   :  { %380 = shalt.err (!%p377_p7)
}
  0xf6   :  { %s384_s24 = smov 128   ;;  %s385_s25 = smov 8  }
  0xf7   :  { %283 = dma.vmem_to_hbm [thread:$0]  %s278_s16, 2048, %s485_s2, [#allocation3], %s384_s24, %s384_s24, %s385_s25  }
  0xf8   :  { %381 = dma.done.wait [#allocation3], 2048  }
  0xf9   :  { %382 = vsyncadd [#allocation3], 4294965248 }
  0xfa   :  { %287 = vsyncpa [#allocation3], 1 }

</bundles_post_ra>
